<compile_context>
chip_gen: v7x
topology: tpu7x:2x2x1
jax: 0.10.0
libtpu: 0.0.40
codegen_flags: <defaults>
</compile_context>

<pallas_src>
from functools import partial

import numpy as np
import jax
import jax.numpy as jnp
from jax.experimental import pallas as pl
from jax.experimental.pallas import tpu as pltpu

_LANE = 128          # TPU lane width
_CHUNK = 512         # rows of a block processed per inner step (bounds temporaries)
_MAX_T_TILE = 16384  # hard cap: 2 MiB HBM read / step at L=32 f32, VMEM-safe everywhere


def _argmax_kernel(e_ref, idx_ref, *, compute_dtype):
    """Row-wise argmax of a [T_TILE, L] block (time on sublanes, labels on lanes)."""
    tt, l = e_ref.shape
    sentinel = jnp.int32(l)

    def _rows(e):
        rows = e.shape[0]
        e = e.astype(compute_dtype)                     # no-op for f32; bf16 stays
                                                        # native on v6e/v7x
        lbl = jax.lax.broadcasted_iota(jnp.int32, (rows, l), 1)
        m = jnp.max(e, axis=-1, keepdims=True)          # lane reduce; NaN propagates
        # first occurrence of the max; if the row holds a NaN, first NaN wins
        is_max = (e == m) | (jnp.isnan(e) & jnp.isnan(m))
        cand = jnp.where(is_max, lbl, sentinel)
        return jnp.min(cand, axis=-1, keepdims=True)    # [rows, 1] int32

    if tt <= _CHUNK:
        idx_ref[...] = _rows(e_ref[...])
    else:
        # Big DMA tile, bounded temporaries: walk the tile in fixed-size chunks.
        # (t_tile is chosen as a multiple of _CHUNK when > _CHUNK.)
        def body(c, carry):
            r0 = pl.multiple_of(c * _CHUNK, _CHUNK)
            idx_ref[pl.ds(r0, _CHUNK), :] = _rows(e_ref[pl.ds(r0, _CHUNK), :])
            return carry

        jax.lax.fori_loop(0, tt // _CHUNK, body, 0)


def _compute_dtype(in_dtype):
    """bf16 compares run natively on v6e/v7x; older gens (v2-v5) need the f32 widen."""
    if jnp.dtype(in_dtype) == jnp.dtype(jnp.bfloat16):
        try:
            kind = jax.devices()[0].device_kind.lower()
        except Exception:
            kind = ""
        if not any(f"v{g}" in kind for g in (2, 3, 4, 5)):
            return jnp.dtype(jnp.bfloat16)
    return jnp.dtype(jnp.float32)


def _vmem_capacity_bytes() -> int:
    try:
        return int(pltpu.get_tpu_info().vmem_capacity_bytes)
    except Exception:
        return 64 << 20          # conservative fallback: v7x per-TensorCore VMEM


def _pick_t_tile(t: int, l: int, itemsize: int):
    """Pick rows-per-grid-step and a matching vmem limit (generation-aware)."""
    vmem_total = _vmem_capacity_bytes()
    # Double-buffered VMEM bytes per time step: the input row lane-pads L -> 128
    # multiples; the (t_tile, 1) int32 output row lane-pads 1 -> 128.
    bpt = 2 * (_LANE * pl.cdiv(l, _LANE) * itemsize + _LANE * 4)
    # Keep ~3/8 of VMEM (plus 8 MiB) free for compiler temporaries / scratch.
    usable = max((vmem_total * 5) // 8 - (8 << 20), 8 << 20)
    t_tile = min(usable // bpt, _MAX_T_TILE)
    if t >= 2 * _LANE:
        # Keep >= 2 grid steps so v7x's two TensorCores can split the
        # "parallel" axis (harmless on single-core v5e/v6e).
        t_tile = min(t_tile, t // 2)
    t_tile = (t_tile // _LANE) * _LANE
    if t_tile > _CHUNK:
        t_tile = (t_tile // _CHUNK) * _CHUNK      # chunked kernel path requirement
    if t_tile >= t or t_tile < _LANE:
        t_tile = t                                # tiny T: one full-extent block
    vmem_limit = int(min(vmem_total - (4 << 20), t_tile * bpt + (24 << 20)))
    return t_tile, vmem_limit


def greedy_argmax(emission: jax.Array) -> jax.Array:
    """emission: [T, L] logits (any float dtype) -> [T] int32 row-wise argmax."""
    t, l = emission.shape
    t_tile, vmem_limit = _pick_t_tile(t, l, emission.dtype.itemsize)
    kernel = partial(_argmax_kernel, compute_dtype=_compute_dtype(emission.dtype))
    out = pl.pallas_call(
        kernel,
        out_shape=jax.ShapeDtypeStruct((t, 1), jnp.int32),
        grid=(pl.cdiv(t, t_tile),),
        in_specs=[pl.BlockSpec((t_tile, l), lambda i: (i, 0))],
        out_specs=pl.BlockSpec((t_tile, 1), lambda i: (i, 0)),
        compiler_params=pltpu.CompilerParams(
            dimension_semantics=("parallel",),
            vmem_limit_bytes=vmem_limit),
        cost_estimate=pl.CostEstimate(
            flops=3 * t * l,
            transcendentals=0,
            bytes_accessed=t * l * emission.dtype.itemsize + t * 4),
    )(emission)
    return out[:, 0]


_greedy_argmax = jax.jit(greedy_argmax)


class GreedyCTCDecoder:
    """JAX/Pallas port of the PyTorch GreedyCTCDecoder (no parameters)."""

    def __init__(self, labels, ignore):
        self.labels = list(labels)
        self._ignore = np.asarray(sorted({int(i) for i in ignore}), dtype=np.int64)

    def __call__(self, emission) -> str:
        idx = np.asarray(jax.block_until_ready(_greedy_argmax(jnp.asarray(emission))))
        if idx.size == 0:
            return ""
        # TODO(synk): unique_consecutive compaction + ignore filter + string join
        # are data-dependent-length / python-string ops with no Pallas equivalent;
        # done with vectorized numpy on the device-computed argmax indices.
        keep = np.empty(idx.shape, dtype=bool)
        keep[0] = True
        np.not_equal(idx[1:], idx[:-1], out=keep[1:])
        collapsed = idx[keep]
        if self._ignore.size:
            collapsed = collapsed[~np.isin(collapsed, self._ignore)]
        return "".join(self.labels[int(i)] for i in collapsed)


if __name__ == "__main__":
    # num_seq = 8 time steps, num_label = 32 labels (index 0 = CTC blank)
    NUM_SEQ, NUM_LABEL = 8, 32
    labels = ['-'] + [chr(ord('a') + i) for i in range(26)] + list(" '.,?")
    assert len(labels) == NUM_LABEL
    ignore = (0,)  # ignore the blank label

    key = jax.random.PRNGKey(0)
    emission = jax.random.normal(key, (NUM_SEQ, NUM_LABEL), dtype=jnp.float32)

    # 1) tiny input: single full-extent block
    idx_small = np.asarray(jax.block_until_ready(_greedy_argmax(emission)))
    assert np.array_equal(idx_small, np.asarray(jnp.argmax(emission, axis=-1)))

    # 2) tiled / pipelined path (grid > 1, chunked kernel body, "parallel" axis)
    big = jax.random.normal(jax.random.PRNGKey(1), (2048, NUM_LABEL), jnp.float32)
    idx_big = np.asarray(jax.block_until_ready(_greedy_argmax(big)))
    assert np.array_equal(idx_big, np.asarray(jnp.argmax(big, axis=-1)))

    # 3) T not a multiple of the tile: exercises the masked partial edge block
    odd = jax.random.normal(jax.random.PRNGKey(2), (1000, NUM_LABEL), jnp.float32)
    idx_odd = np.asarray(jax.block_until_ready(_greedy_argmax(odd)))
    assert np.array_equal(idx_odd, np.asarray(jnp.argmax(odd, axis=-1)))

    decoder = GreedyCTCDecoder(labels, ignore)
    transcript = decoder(emission)
    assert isinstance(transcript, str)
    print("KERNEL_OK")
</pallas_src>

<mosaic_0001>
module attributes {stable_mosaic.version = 11 : i64} {
  func.func @_argmax_kernel(%arg0: i32, %arg1: memref<8x32xf32, #tpu.memory_space<vmem>>, %arg2: memref<8x1xi32, #tpu.memory_space<vmem>>) attributes {dimension_semantics = [#tpu.dimension_semantics<parallel>], iteration_bounds = array<i64: 1>, scalar_prefetch = 0 : i64, scratch_operands = 0 : i64, tpu.core_type = #tpu.core_type<tc>, window_params = [{transform_indices = @transform_0, window_bounds = array<i64: 8, 32>}, {transform_indices = @transform_1, window_bounds = array<i64: 8, 1>}]} {
    %c0 = arith.constant 0 : index
    %c0_0 = arith.constant 0 : index
    %0 = vector.load %arg1[%c0, %c0_0] : memref<8x32xf32, #tpu.memory_space<vmem>>, vector<8x32xf32>
    %1 = tpu.iota {dimensions = array<i32: 1>} : vector<8x32xi32>
    %cst = arith.constant dense<0xFF800000> : vector<8xf32>
    %2 = vector.multi_reduction <maximumf>, %0, %cst [1] : vector<8x32xf32> to vector<8xf32>
    %3 = vector.shape_cast %2 : vector<8xf32> to vector<8x1xf32>
    %4 = vector.broadcast %3 : vector<8x1xf32> to vector<8x32xf32>
    %5 = arith.cmpf oeq, %0, %4 : vector<8x32xf32>
    %6 = arith.cmpf one, %0, %0 : vector<8x32xf32>
    %7 = arith.cmpf one, %3, %3 : vector<8x1xf32>
    %8 = vector.broadcast %7 : vector<8x1xi1> to vector<8x32xi1>
    %9 = arith.andi %6, %8 : vector<8x32xi1>
    %10 = arith.ori %5, %9 : vector<8x32xi1>
    %c32_i32 = arith.constant 32 : i32
    %11 = vector.broadcast %c32_i32 : i32 to vector<8x32xi32>
    %12 = arith.select %10, %1, %11 : vector<8x32xi1>, vector<8x32xi32>
    %cst_1 = arith.constant dense<2147483647> : vector<8xi32>
    %13 = vector.multi_reduction <minsi>, %12, %cst_1 [1] : vector<8x32xi32> to vector<8xi32>
    %14 = vector.shape_cast %13 : vector<8xi32> to vector<8x1xi32>
    %c0_2 = arith.constant 0 : index
    %c0_3 = arith.constant 0 : index
    %15 = vector.load %arg2[%c0_2, %c0_3] : memref<8x1xi32, #tpu.memory_space<vmem>>, vector<8x1xi32>
    tpu.vector_store %arg2[%c0_2, %c0_3], %14 {strides = array<i32>} : memref<8x1xi32, #tpu.memory_space<vmem>>, vector<8x1xi32>,
    return
  }
  func.func @transform_0(%arg0: i32) -> (i32, i32) {
    %c0_i32 = arith.constant 0 : i32
    %c0_i32_0 = arith.constant 0 : i32
    return %arg0, %c0_i32 : i32, i32
  }
  func.func @transform_1(%arg0: i32) -> (i32, i32) {
    %c0_i32 = arith.constant 0 : i32
    %c0_i32_0 = arith.constant 0 : i32
    return %arg0, %c0_i32 : i32, i32
  }
}

</mosaic_0001>

<bundles_post_ra>
// kernel: greedy_argmax.1
= control target key start
LH: loop header
LB: loop body
LE: loop exit
PB: predicated region body
PF: predicated region fallthrough
CT: control target
= control target key end

     0   :  { %6 = vsyncpa [#allocation3], 0  ;;  %s82_s6 = smov [#allocation2]   ;;  %s108_s0 = inlined_call_operand.hbm [shape: f32[8,32], index: 0, kind: input, shape index: {}]   ;;  %s109_s1 = inlined_call_operand.vmem [shape: s32[8,1], index: 1, kind: output, shape index: {}]  }
   0x1   :  { %s13_s7 = sshll.u32 %s82_s6, 4  ;;  %s58_s10 = scalar_lea.hbm %s108_s0, 128  ;;  %s14_s7 = int_to_ptr.vmem [resolvable:$true] %s13_s7 }
   0x2   :  { %p59_p0 = scmp.ne.s32.totalorder %s108_s0, %s58_s10  ;;  %p62_p1 = scmp.lt.u32.totalorder %s58_s10, %s108_s0 }
   0x4   :  { %p64_p2 = pnand %p62_p1, %p59_p0 }
   0x6   :  { %67 = shalt.err (!%p64_p2)
}
   0x7   :  { %s68_s15 = scalar_lea.vmem %s14_s7, 128  ;;  %p73_p4 = scmp.lt.s32.totalorder %s14_s7, %s14_s7 }
   0x8   :  { %p69_p3 = scmp.ne.s32.totalorder %s14_s7, %s68_s15  ;;  %p74_p5 = scmp.lt.s32.totalorder %s68_s15, %s68_s15 }
   0xa   :  { %p75_p6 = por %p74_p5, %p73_p4 }
   0xc   :  { %p76_p7 = pnand %p75_p6, %p69_p3 }
   0xe   :  { %79 = shalt.err (!%p76_p7)
}
   0xf   :  { %16 = dma.hbm_to_vmem [thread:$0]  %s108_s0, 128, %s14_s7, [#allocation3]  }
  0x10   :  { %80 = dma.done.wait [#allocation3], 128  }
  0x11   :  { %81 = vsyncadd [#allocation3], 4294967168  ;;  %vm23_vm0 = vcmask 261120   ;;  %v20_v0 = vld [vmem:[#allocation2] sm:$0xff]  ;;  %v21_v2 = vlaneseq  ;;  %vm50_vm7 = vcmask 7168  }
  0x12   :  { %v24_v1 = vsel %vm23_vm0, %v20_v0, -inf  ;;  %vm28_vm1 = vcmp.ne.f32.partialorder %v20_v0, %v20_v0 }
  0x13   :  { %25 = vmax.xlane.f32.xlu0 %v24_v1  ;;  %v22_v3 = vand.u32 127, %v21_v2 }
  0xa0   :  { %v26_v4 = vpop.xlane.xlu0 %25 }
  0xa1   :  { %vm27_vm2 = vcmp.eq.f32.partialorder %v20_v0, %v26_v4  ;;  %vm29_vm3 = vcmp.ne.f32.partialorder %v26_v4, %v26_v4 }
  0xa2   :  { %vm32_vm4 = vmand %vm28_vm1, %vm29_vm3 }
  0xa3   :  { %vm33_vm5 = vmor %vm27_vm2, %vm32_vm4 }
  0xa4   :  { %v34_v5 = vsel %vm33_vm5, %v22_v3, 32 }
  0xa5   :  { %v35_v6 = vsel %vm23_vm0, %v34_v5, 2147483647 }
  0xa6   :  { %v37_v7 = vshra.s32 %v35_v6, 16  ;;  %v36_v9 = vand.u32 65535, %v35_v6 }
  0xa8   :  { %v39_v8 = vcvt.s32.f32 %v37_v7  ;;  %v38_v11 = vcvt.s32.f32 %v36_v9 }
  0xaa   :  { %40 = vmin.xlane.f32.xlu0 %v39_v8 }
 0x137   :  { %v41_v10 = vpop.xlane.xlu0 %40 }
 0x138   :  { %vm42_vm6 = vcmp.eq.f32.partialorder %v39_v8, %v41_v10  ;;  %v47_v13 = vcvt.f32.s32 %v41_v10 }
 0x139   :  { %v43_v12 = vsel %vm42_vm6, %v38_v11, inf }
 0x13a   :  { %44 = vmin.xlane.f32.xlu1 %v43_v12  ;;  %v48_v15 = vshll.u32 %v47_v13, 16 }
 0x1c7   :  { %v45_v14 = vpop.xlane.xlu1 %44 }
 0x1c8   :  { %v46_v16 = vcvt.f32.s32 %v45_v14 }
 0x1ca   :  { %v49_v17 = vadd.s32 %v48_v15, %v46_v16 }
 0x1cc   :  { %51 = vst.msk [vmem:[%s109_s1] sm:$0xff] %vm50_vm7, %v49_v17 }
 0x1cd   :  { %56 = vsyncpa [#allocation3], 1 }

</bundles_post_ra>
